<compile_context>
chip_gen: v6e
topology: v6e:2x2x1
jax: 0.10.0
libtpu: 0.0.40
codegen_flags: <defaults>
</compile_context>

<pallas_src>
import functools

import jax
import jax.numpy as jnp
from jax import lax
from jax.experimental import pallas as pl
from jax.experimental.pallas import tpu as pltpu

_LANES = 128
_SUBLANES = 8
_TILE_ROWS = 2048   # (2048, 128) f32 block = 1 MiB per input stream
_NUM_CHUNKS = 2     # parallel chunks on the reduction grid (uses both TCs on v7x)


def _round_up(a, b):
    return ((a + b - 1) // b) * b


def _mse_reduce_kernel(x_ref, y_ref, o_ref, acc_ref, *,
                       activation_1, activation_2,
                       rows, tile_rows, steps_per_chunk, needs_mask):
    """Accumulate sum((x-y)^2) per chunk; emit a (1,128) partial at end of chunk."""
    c = pl.program_id(0)
    i = pl.program_id(1)

    @pl.when(i == 0)
    def _():
        acc_ref[...] = jnp.zeros_like(acc_ref)

    x = x_ref[...].astype(jnp.float32)
    y = y_ref[...].astype(jnp.float32)
    if activation_1 is not None:
        x = activation_1(x)
    if activation_2 is not None:
        y = activation_2(y)
    d = x - y
    sq = d * d

    if needs_mask:
        # Zero out rows belonging to partial / duplicated boundary blocks so garbage
        # never reaches the accumulator.  (Pure VPU work; hides under the DMA.)
        step = c * steps_per_chunk + i
        row_ids = lax.broadcasted_iota(jnp.int32, (tile_rows, 1), 0)
        sq = jnp.where(row_ids < (rows - step * tile_rows), sq, 0.0)

    # Vector accumulator: per-step work is plain elementwise VALU adds.
    acc_ref[...] += sq

    @pl.when(i == steps_per_chunk - 1)
    def _():
        # Single cross-sublane reduce per chunk -> (1, 128) lane-dense partial.
        o_ref[...] = jnp.sum(acc_ref[...], axis=0, keepdims=True)


def _mse_elementwise_kernel(x_ref, y_ref, o_ref, *, activation_1, activation_2):
    """reduction='none': per-element squared difference."""
    x = x_ref[...].astype(jnp.float32)
    y = y_ref[...].astype(jnp.float32)
    if activation_1 is not None:
        x = activation_1(x)
    if activation_2 is not None:
        y = activation_2(y)
    d = x - y
    o_ref[...] = (d * d).astype(o_ref.dtype)


def mse_loss_pallas(logits_1, logits_2, reduction="mean",
                    activation_1=None, activation_2=None):
    """Pallas equivalent of LAMDA_SSL MSE.forward / F.mse_loss."""
    assert logits_1.shape == logits_2.shape, "mse_loss requires matching shapes"
    if reduction not in ("mean", "sum", "none"):
        raise ValueError(f"unsupported reduction: {reduction}")

    orig_shape = logits_1.shape
    orig_dtype = jnp.result_type(logits_1.dtype, logits_2.dtype)
    n = logits_1.size

    x_flat = jnp.ravel(logits_1)
    y_flat = jnp.ravel(logits_2)

    n_main = (n // _LANES) * _LANES     # lane-aligned prefix handled by Pallas
    rows = n_main // _LANES
    has_tail = n_main < n

    def _tail_sq():
        xt = x_flat[n_main:].astype(jnp.float32)
        yt = y_flat[n_main:].astype(jnp.float32)
        if activation_1 is not None:
            xt = activation_1(xt)
        if activation_2 is not None:
            yt = activation_2(yt)
        return (xt - yt) ** 2

    if rows == 0:
        # Fewer than 128 elements: not worth a kernel launch; tiny plain-JAX path.
        sq = _tail_sq()
        if reduction == "none":
            return sq.astype(orig_dtype).reshape(orig_shape)
        s = jnp.sum(sq)
        if reduction == "mean":
            s = s / jnp.float32(n)
        return s.astype(orig_dtype)

    tile_rows = min(_TILE_ROWS, _round_up(rows, _SUBLANES))
    total_steps = pl.cdiv(rows, tile_rows)

    if n_main == n:
        x2 = x_flat.reshape(rows, _LANES)      # zero-copy lane-dense view
        y2 = y_flat.reshape(rows, _LANES)
    else:
        x2 = x_flat[:n_main].reshape(rows, _LANES)
        y2 = y_flat[:n_main].reshape(rows, _LANES)

    in_bytes = n_main * (x2.dtype.itemsize + y2.dtype.itemsize)

    if reduction == "none":
        kern = functools.partial(_mse_elementwise_kernel,
                                 activation_1=activation_1,
                                 activation_2=activation_2)
        out2 = pl.pallas_call(
            kern,
            out_shape=jax.ShapeDtypeStruct((rows, _LANES), orig_dtype),
            grid_spec=pltpu.PrefetchScalarGridSpec(
                num_scalar_prefetch=0,
                grid=(total_steps,),
                in_specs=[pl.BlockSpec((tile_rows, _LANES), lambda i: (i, 0)),
                          pl.BlockSpec((tile_rows, _LANES), lambda i: (i, 0))],
                out_specs=pl.BlockSpec((tile_rows, _LANES), lambda i: (i, 0)),
            ),
            compiler_params=pltpu.CompilerParams(
                dimension_semantics=("parallel",)),
            cost_estimate=pl.CostEstimate(
                flops=3 * n_main, transcendentals=0,
                bytes_accessed=in_bytes + n_main * orig_dtype.itemsize),
        )(x2, y2)
        out = out2.reshape(-1)
        if has_tail:
            out = jnp.concatenate([out, _tail_sq().astype(orig_dtype)])
        return out.reshape(orig_shape)

    # reduction in ('mean', 'sum')
    num_chunks = min(_NUM_CHUNKS, total_steps)
    steps_per_chunk = pl.cdiv(total_steps, num_chunks)
    needs_mask = (num_chunks * steps_per_chunk * tile_rows != rows)

    def in_map(c, i):
        # Clamp so DMAs of duplicated trailing blocks stay in-bounds; the in-kernel
        # mask zeroes their contribution.
        return (jnp.minimum(c * steps_per_chunk + i, total_steps - 1), 0)

    kern = functools.partial(_mse_reduce_kernel,
                             activation_1=activation_1,
                             activation_2=activation_2,
                             rows=rows, tile_rows=tile_rows,
                             steps_per_chunk=steps_per_chunk,
                             needs_mask=needs_mask)
    partials = pl.pallas_call(
        kern,
        out_shape=jax.ShapeDtypeStruct((num_chunks, _LANES), jnp.float32),
        grid_spec=pltpu.PrefetchScalarGridSpec(
            num_scalar_prefetch=0,
            grid=(num_chunks, steps_per_chunk),
            in_specs=[pl.BlockSpec((tile_rows, _LANES), in_map),
                      pl.BlockSpec((tile_rows, _LANES), in_map)],
            out_specs=pl.BlockSpec((1, _LANES), lambda c, i: (c, 0)),
            scratch_shapes=[pltpu.VMEM((tile_rows, _LANES), jnp.float32)],
        ),
        compiler_params=pltpu.CompilerParams(
            dimension_semantics=("parallel", "arbitrary")),
        cost_estimate=pl.CostEstimate(
            flops=3 * n_main, transcendentals=0,
            bytes_accessed=in_bytes + num_chunks * _LANES * 4),
    )(x2, y2)

    total = jnp.sum(partials)                    # tiny (num_chunks*128) JAX reduce
    if has_tail:
        total = total + jnp.sum(_tail_sq())
    if reduction == "mean":
        total = total / jnp.float32(n)
    # PyTorch returns a 0-d tensor in the promoted input dtype; f32 accumulation then cast.
    return total.astype(orig_dtype)


class MSE:
    """JAX/Pallas mirror of the PyTorch LAMDA_SSL MSE module."""

    def __init__(self, reduction="mean", activation_1=None, activation_2=None):
        self.reduction = reduction
        self.activation_1 = activation_1
        self.activation_2 = activation_2

    def __call__(self, logits_1, logits_2):
        return mse_loss_pallas(logits_1, logits_2, reduction=self.reduction,
                               activation_1=self.activation_1,
                               activation_2=self.activation_2)


if __name__ == "__main__":
    key = jax.random.PRNGKey(0)
    k1, k2, k3, k4 = jax.random.split(key, 4)

    # classification-style logits: (batch=8, num_classes=32) -> 256 elems (lane aligned)
    logits_1 = jax.random.normal(k1, (8, 32), dtype=jnp.float32)
    logits_2 = jax.random.normal(k2, (8, 32), dtype=jnp.float32)

    loss = MSE(reduction="mean")(logits_1, logits_2)
    jax.block_until_ready(loss)
    ref = jnp.mean((logits_1 - logits_2) ** 2)
    assert jnp.allclose(loss, ref, rtol=1e-5, atol=1e-6), (loss, ref)

    s = MSE(reduction="sum")(logits_1, logits_2)
    jax.block_until_ready(s)
    assert jnp.allclose(s, jnp.sum((logits_1 - logits_2) ** 2), rtol=1e-5, atol=1e-4)

    e = MSE(reduction="none")(logits_1, logits_2)
    jax.block_until_ready(e)
    assert e.shape == logits_1.shape
    assert jnp.allclose(e, (logits_1 - logits_2) ** 2, rtol=1e-5, atol=1e-6)

    # element count NOT a multiple of 128 -> exercises in-kernel mask + JAX tail path
    a = jax.random.normal(k3, (2, 4, 5, 5), dtype=jnp.float32)   # 200 elements
    b = jax.random.normal(k4, (2, 4, 5, 5), dtype=jnp.float32)
    m = MSE(reduction="mean")(a, b)
    jax.block_until_ready(m)
    assert jnp.allclose(m, jnp.mean((a - b) ** 2), rtol=1e-5, atol=1e-6)

    # elementwise activations (applied in-kernel before masking)
    act = MSE(reduction="mean", activation_1=jax.nn.sigmoid,
              activation_2=jax.nn.sigmoid)(logits_1, logits_2)
    jax.block_until_ready(act)
    act_ref = jnp.mean((jax.nn.sigmoid(logits_1) - jax.nn.sigmoid(logits_2)) ** 2)
    assert jnp.allclose(act, act_ref, rtol=1e-5, atol=1e-6)

    print("KERNEL_OK")
</pallas_src>

<mosaic_0001>
module attributes {stable_mosaic.version = 11 : i64} {
  func.func @_mse_reduce_kernel(%arg0: i32, %arg1: i32, %arg2: memref<8x128xf32, #tpu.memory_space<vmem>>, %arg3: memref<8x128xf32, #tpu.memory_space<vmem>>, %arg4: memref<1x128xf32, #tpu.memory_space<vmem>>, %arg5: memref<8x128xf32, #tpu.memory_space<vmem>>) attributes {dimension_semantics = [#tpu.dimension_semantics<parallel>, #tpu.dimension_semantics<arbitrary>], iteration_bounds = array<i64: 1, 1>, scalar_prefetch = 0 : i64, scratch_operands = 1 : i64, tpu.core_type = #tpu.core_type<tc>, window_params = [{transform_indices = @transform_0, window_bounds = array<i64: 8, 128>}, {transform_indices = @transform_1, window_bounds = array<i64: 8, 128>}, {transform_indices = @transform_2, window_bounds = array<i64: 1, 128>}]} {
    %c0_i32 = arith.constant 0 : i32
    %0 = arith.cmpi eq, %arg1, %c0_i32 : i32
    %1 = arith.extui %0 : i1 to i32
    %c0_i32_0 = arith.constant 0 : i32
    %2 = arith.cmpi ne, %1, %c0_i32_0 : i32
    scf.if %2 {
      %cst_10 = arith.constant 0.000000e+00 : f32
      %24 = vector.broadcast %cst_10 : f32 to vector<8x128xf32>
      %c0_11 = arith.constant 0 : index
      %c0_12 = arith.constant 0 : index
      %25 = vector.load %arg5[%c0_11, %c0_12] : memref<8x128xf32, #tpu.memory_space<vmem>>, vector<8x128xf32>
      tpu.vector_store %arg5[%c0_11, %c0_12], %24 {strides = array<i32>} : memref<8x128xf32, #tpu.memory_space<vmem>>, vector<8x128xf32>,
    } else {
    }
    %c0 = arith.constant 0 : index
    %c0_1 = arith.constant 0 : index
    %3 = vector.load %arg2[%c0, %c0_1] : memref<8x128xf32, #tpu.memory_space<vmem>>, vector<8x128xf32>
    %c0_2 = arith.constant 0 : index
    %c0_3 = arith.constant 0 : index
    %4 = vector.load %arg3[%c0_2, %c0_3] : memref<8x128xf32, #tpu.memory_space<vmem>>, vector<8x128xf32>
    %5 = arith.subf %3, %4 : vector<8x128xf32>
    %6 = arith.mulf %5, %5 : vector<8x128xf32>
    %c1_i32 = arith.constant 1 : i32
    %7 = arith.muli %arg0, %c1_i32 : i32
    %8 = arith.addi %7, %arg1 : i32
    %9 = tpu.iota {dimensions = array<i32: 0>} : vector<8x1xi32>
    %c8_i32 = arith.constant 8 : i32
    %10 = arith.muli %8, %c8_i32 : i32
    %c2_i32 = arith.constant 2 : i32
    %11 = arith.subi %c2_i32, %10 : i32
    %12 = vector.broadcast %11 : i32 to vector<8x1xi32>
    %13 = arith.cmpi slt, %9, %12 : vector<8x1xi32>
    %cst = arith.constant 0.000000e+00 : f32
    %14 = vector.shape_cast %13 : vector<8x1xi1> to vector<8x1xi1>
    %15 = vector.broadcast %14 : vector<8x1xi1> to vector<8x128xi1>
    %16 = vector.broadcast %cst : f32 to vector<8x128xf32>
    %17 = arith.select %15, %6, %16 : vector<8x128xi1>, vector<8x128xf32>
    %c0_4 = arith.constant 0 : index
    %c0_5 = arith.constant 0 : index
    %18 = vector.load %arg5[%c0_4, %c0_5] : memref<8x128xf32, #tpu.memory_space<vmem>>, vector<8x128xf32>
    %19 = arith.addf %18, %17 : vector<8x128xf32>
    %c0_6 = arith.constant 0 : index
    %c0_7 = arith.constant 0 : index
    %20 = vector.load %arg5[%c0_6, %c0_7] : memref<8x128xf32, #tpu.memory_space<vmem>>, vector<8x128xf32>
    tpu.vector_store %arg5[%c0_6, %c0_7], %19 {strides = array<i32>} : memref<8x128xf32, #tpu.memory_space<vmem>>, vector<8x128xf32>,
    %c0_i32_8 = arith.constant 0 : i32
    %21 = arith.cmpi eq, %arg1, %c0_i32_8 : i32
    %22 = arith.extui %21 : i1 to i32
    %c0_i32_9 = arith.constant 0 : i32
    %23 = arith.cmpi ne, %22, %c0_i32_9 : i32
    scf.if %23 {
      %c0_10 = arith.constant 0 : index
      %c0_11 = arith.constant 0 : index
      %24 = vector.load %arg5[%c0_10, %c0_11] : memref<8x128xf32, #tpu.memory_space<vmem>>, vector<8x128xf32>
      %cst_12 = arith.constant dense<0.000000e+00> : vector<128xf32>
      %25 = vector.multi_reduction <add>, %24, %cst_12 [0] : vector<8x128xf32> to vector<128xf32>
      %26 = vector.shape_cast %25 : vector<128xf32> to vector<1x128xf32>
      %c0_13 = arith.constant 0 : index
      %c0_14 = arith.constant 0 : index
      %27 = vector.load %arg4[%c0_13, %c0_14] : memref<1x128xf32, #tpu.memory_space<vmem>>, vector<1x128xf32>
      tpu.vector_store %arg4[%c0_13, %c0_14], %26 {strides = array<i32>} : memref<1x128xf32, #tpu.memory_space<vmem>>, vector<1x128xf32>,
    } else {
    }
    return
  }
  func.func @transform_0(%arg0: i32, %arg1: i32) -> (i32, i32) {
    %c1_i32 = arith.constant 1 : i32
    %0 = arith.muli %arg0, %c1_i32 : i32
    %1 = arith.addi %0, %arg1 : i32
    %c0_i32 = arith.constant 0 : i32
    %2 = arith.minsi %1, %c0_i32 : i32
    %c0_i32_0 = arith.constant 0 : i32
    %c0_i32_1 = arith.constant 0 : i32
    return %2, %c0_i32_0 : i32, i32
  }
  func.func @transform_1(%arg0: i32, %arg1: i32) -> (i32, i32) {
    %c1_i32 = arith.constant 1 : i32
    %0 = arith.muli %arg0, %c1_i32 : i32
    %1 = arith.addi %0, %arg1 : i32
    %c0_i32 = arith.constant 0 : i32
    %2 = arith.minsi %1, %c0_i32 : i32
    %c0_i32_0 = arith.constant 0 : i32
    %c0_i32_1 = arith.constant 0 : i32
    return %2, %c0_i32_0 : i32, i32
  }
  func.func @transform_2(%arg0: i32, %arg1: i32) -> (i32, i32) {
    %c0_i32 = arith.constant 0 : i32
    %c0_i32_0 = arith.constant 0 : i32
    return %arg0, %c0_i32 : i32, i32
  }
}

</mosaic_0001>

<bundles_post_ra>
// kernel: tpu_custom_call.1
= control target key start
LH: loop header
LB: loop body
LE: loop exit
PB: predicated region body
PF: predicated region fallthrough
CT: control target
= control target key end

     0   :  { %7 = vsyncpa [#allocation4], 0  ;;  %s225_s0 = inlined_call_operand.hbm [shape: f32[2,128], index: 0, kind: input, shape index: {}]   ;;  %s226_s1 = inlined_call_operand.hbm [shape: f32[2,128], index: 1, kind: input, shape index: {}]   ;;  %s227_s2 = inlined_call_operand.hbm [shape: f32[1,128], index: 2, kind: output, shape index: {}]  }
   0x1   :  { %8 = vsyncpa [#allocation7], 0 }
   0x2   :  { %9 = vsyncpa [#allocation5], 0 }
   0x3   :  { %20 = vsyncadd [#allocation4], 96  ;;  %s196_s9 = smov [#allocation3]  }
   0x4   :  { %s25_s10 = sshll.u32 %s196_s9, 4  ;;  %s26_s10 = int_to_ptr.vmem [resolvable:$true] %s25_s10 }
   0x5   :  { %s138_s11 = scalar_lea.vmem %s26_s10, 32  ;;  %s142_s12 = scalar_lea.vmem %s26_s10, 128 }
   0x6   :  { %p139_p0 = scmp.ne.s32.totalorder %s26_s10, %s138_s11  ;;  %p143_p1 = scmp.lt.s32.totalorder %s26_s10, %s26_s10 }
   0x7   :  { %p144_p2 = scmp.lt.s32.totalorder %s142_s12, %s138_s11 }
   0x9   :  { %p145_p3 = por %p144_p2, %p143_p1 }
   0xb   :  { %p146_p4 = pnand %p145_p3, %p139_p0 }
   0xd   :  { %149 = shalt.err (!%p146_p4)
}
   0xe   :  { %s197_s13 = smov 32   ;;  %s198_s14 = smov 2  }
   0xf   :  { %31 = dma.hbm_to_vmem [thread:$0]  %s225_s0, 32, %s26_s10, [#allocation4], %s197_s13, %s197_s13, %s198_s14  }
  0x10   :  { %42 = vsyncadd [#allocation7], 96  ;;  %s199_s17 = smov [#allocation6]  }
  0x11   :  { %s47_s18 = sshll.u32 %s199_s17, 4  ;;  %s48_s18 = int_to_ptr.vmem [resolvable:$true] %s47_s18 }
  0x12   :  { %s158_s19 = scalar_lea.vmem %s48_s18, 32  ;;  %s162_s20 = scalar_lea.vmem %s48_s18, 128 }
  0x13   :  { %p159_p5 = scmp.ne.s32.totalorder %s48_s18, %s158_s19  ;;  %p163_p6 = scmp.lt.s32.totalorder %s48_s18, %s48_s18 }
  0x14   :  { %p164_p7 = scmp.lt.s32.totalorder %s162_s20, %s158_s19 }
  0x16   :  { %p165_p8 = por %p164_p7, %p163_p6 }
  0x18   :  { %p166_p9 = pnand %p165_p8, %p159_p5 }
  0x1a   :  { %169 = shalt.err (!%p166_p9)
}
  0x1b   :  { %53 = dma.hbm_to_vmem [thread:$0]  %s226_s1, 32, %s48_s18, [#allocation7], %s197_s13, %s197_s13, %s198_s14  }
  0x1c   :  { %190 = dma.done.wait [#allocation4], 128  }
  0x1d   :  { %191 = vsyncadd [#allocation4], 4294967168 }
  0x1e   :  { %192 = dma.done.wait [#allocation7], 128  }
  0x1f   :  { %193 = vsyncadd [#allocation7], 4294967168  ;;  %v82_v0 = vlaneseq  ;;  %v77_v2 = vld [vmem:[#allocation3] sm:$0xff]  ;;  %v78_v3 = vld [vmem:[#allocation6] sm:$0xff]  ;;  %s200_s0 = smov [#allocation8]  }
  0x20   :  { %v79_v4 = vsub.f32 %v77_v2, %v78_v3  ;;  %s111_s23 = sshll.u32 %s200_s0, 4  ;;  %s112_s23 = int_to_ptr.vmem [resolvable:$true] %s111_s23 }
  0x21   :  { %v83_v1 = vshrl.u32 %v82_v0, 7  ;;  %s170_s1 = scalar_lea.vmem %s112_s23, 16  ;;  %s174_s24 = scalar_lea.vmem %s112_s23, 32 }
  0x22   :  { %v80_v5 = vmul.f32 %v79_v4, %v79_v4  ;;  %p171_p10 = scmp.ne.s32.totalorder %s112_s23, %s170_s1  ;;  %p175_p11 = scmp.lt.s32.totalorder %s112_s23, %s112_s23 }
  0x23   :  { %vm87_vm0 = vcmp.lt.s32.totalorder %v83_v1, 2  ;;  %p176_p12 = scmp.lt.s32.totalorder %s174_s24, %s170_s1 }
  0x24   :  { %v90_v6 = vsel %vm87_vm0, %v80_v5, 0.0 }
  0x25   :  { %v98_v7 = vrot.slane %v90_v6, 4  ;;  %p177_p13 = por %p176_p12, %p175_p11 }
  0x27   :  { %v99_v8 = vadd.f32 %v98_v7, %v90_v6  ;;  %p178_p0 = pnand %p177_p13, %p171_p10 }
  0x29   :  { %v100_v9 = vrot.slane %v99_v8, 2 }
  0x2b   :  { %v101_v10 = vadd.f32 %v100_v9, %v99_v8 }
  0x2d   :  { %v102_v11 = vrot.slane %v101_v10, 1 }
  0x2f   :  { %v103_v12 = vadd.f32 %v102_v11, %v101_v10 }
  0x31   :  { %104 = vst [vmem:[#allocation8] sm:$0x1] %v103_v12 }
  0x32   :  { %181 = shalt.err (!%p178_p0)
}
  0x33   :  { %114 = dma.vmem_to_hbm [thread:$0]  %s112_s23, 16, %s227_s2, [#allocation5]  }
  0x34   :  { %194 = dma.done.wait [#allocation5], 16  }
  0x35   :  { %195 = vsyncadd [#allocation5], 4294967280 }
  0x36   :  { %118 = vsyncpa [#allocation4], 1 }
  0x37   :  { %119 = vsyncpa [#allocation7], 1 }
  0x38   :  { %120 = vsyncpa [#allocation5], 1 }

</bundles_post_ra>
